<compile_context>
chip_gen: v7x
topology: tpu7x:2x2x1
jax: 0.10.0
libtpu: 0.0.40
codegen_flags: <defaults>
</compile_context>

<pallas_src>
import jax
import jax.numpy as jnp
from jax import lax
from jax.experimental import pallas as pl
from jax.experimental.pallas import tpu as pltpu


def _round_up(x, m):
    return ((x + m - 1) // m) * m


# ---------------------------------------------------------------------------
# Kernel 1: fused (im2col conv) matmul + folded-BN scale/bias + ReLU.
# ---------------------------------------------------------------------------
def _conv_bn_relu_kernel(p_ref, w_ref, s_ref, b_ref, o_ref):
    # p_ref: (TILE_ROWS, K) patches, w_ref: (K, CO), s_ref/b_ref: (1, CO)
    acc = jnp.dot(p_ref[...], w_ref[...], preferred_element_type=jnp.float32)
    y = acc * s_ref[...] + b_ref[...]          # inference BatchNorm (folded)
    o_ref[...] = jnp.maximum(y, 0.0).astype(o_ref.dtype)


def _conv_bn_relu(patches2d, w2d, scale, bias, *, max_tile_rows=256):
    rows, k = patches2d.shape
    co = w2d.shape[1]

    tile = min(max_tile_rows, _round_up(rows, 8))
    rows_p = _round_up(rows, tile)
    if rows_p != rows:
        patches2d = jnp.pad(patches2d, ((0, rows_p - rows), (0, 0)))

    out = pl.pallas_call(
        _conv_bn_relu_kernel,
        out_shape=jax.ShapeDtypeStruct((rows_p, co), patches2d.dtype),
        grid_spec=pltpu.PrefetchScalarGridSpec(
            num_scalar_prefetch=0,
            grid=(rows_p // tile,),
            in_specs=[
                pl.BlockSpec((tile, k), lambda i: (i, 0)),
                pl.BlockSpec((k, co), lambda i: (0, 0)),
                pl.BlockSpec((1, co), lambda i: (0, 0)),
                pl.BlockSpec((1, co), lambda i: (0, 0)),
            ],
            out_specs=pl.BlockSpec((tile, co), lambda i: (i, 0)),
        ),
        compiler_params=pltpu.CompilerParams(
            dimension_semantics=("parallel",)),
    )(patches2d, w2d, scale.reshape(1, co), bias.reshape(1, co))
    return out[:rows]


# ---------------------------------------------------------------------------
# Kernel 2: 3x3 / stride-2 max-pool as an elementwise max over 9 window taps.
# ---------------------------------------------------------------------------
def _max_taps_kernel(t_ref, o_ref):
    # t_ref: (N_TAPS, TILE_ROWS, C) -> max over tap axis
    o_ref[...] = jnp.max(t_ref[...], axis=0).astype(o_ref.dtype)


def _max_over_taps(taps, *, max_tile_rows=512):
    n_taps, rows, c = taps.shape

    tile = min(max_tile_rows, _round_up(rows, 8))
    rows_p = _round_up(rows, tile)
    if rows_p != rows:
        taps = jnp.pad(taps, ((0, 0), (0, rows_p - rows), (0, 0)))

    out = pl.pallas_call(
        _max_taps_kernel,
        out_shape=jax.ShapeDtypeStruct((rows_p, c), taps.dtype),
        grid_spec=pltpu.PrefetchScalarGridSpec(
            num_scalar_prefetch=0,
            grid=(rows_p // tile,),
            in_specs=[pl.BlockSpec((n_taps, tile, c), lambda i: (0, i, 0))],
            out_specs=pl.BlockSpec((tile, c), lambda i: (i, 0)),
        ),
        compiler_params=pltpu.CompilerParams(
            dimension_semantics=("parallel",)),
    )(taps)
    return out[:rows]


# ---------------------------------------------------------------------------
# Module forward: conv1 -> bn1 -> relu -> maxpool  (share_net = 1 path)
# ---------------------------------------------------------------------------
def thermal_module_forward(x_nchw, conv_w, bn_gamma, bn_beta, bn_mean, bn_var,
                           *, eps=1e-5):
    n, ci, h, w = x_nchw.shape
    co, ci_w, kh, kw = conv_w.shape
    assert ci == ci_w
    stride, pad = 2, 3
    oh = (h + 2 * pad - kh) // stride + 1
    ow = (w + 2 * pad - kw) // stride + 1

    # Fold BatchNorm (inference) into per-channel scale / bias with rsqrt.
    inv_std = lax.rsqrt(bn_var.astype(jnp.float32) + eps)
    scale = (bn_gamma * inv_std).astype(x_nchw.dtype)
    bias = (bn_beta - bn_mean * bn_gamma * inv_std).astype(x_nchw.dtype)

    # NCHW -> NHWC (channels-last), pad, build stride-2 im2col patches:
    #   patch[..., (dkh*KW + dkw)*Ci + ci] = x_pad[n, 2*oh + dkh, 2*ow + dkw, ci]
    x_nhwc = jnp.transpose(x_nchw, (0, 2, 3, 1))
    x_pad = jnp.pad(x_nhwc, ((0, 0), (pad, pad), (pad, pad), (0, 0)))
    conv_taps = []
    for dkh in range(kh):
        for dkw in range(kw):
            conv_taps.append(lax.slice(
                x_pad,
                (0, dkh, dkw, 0),
                (n, dkh + stride * (oh - 1) + 1,
                 dkw + stride * (ow - 1) + 1, ci),
                (1, stride, stride, 1)))
    patches = jnp.concatenate(conv_taps, axis=-1)          # (N, OH, OW, KH*KW*Ci)
    patches2d = patches.reshape(n * oh * ow, kh * kw * ci)

    # (Co, Ci, KH, KW) -> (KH*KW*Ci, Co), matching the patch ordering above.
    w2d = jnp.transpose(conv_w, (2, 3, 1, 0)).reshape(kh * kw * ci, co)

    y2d = _conv_bn_relu(patches2d, w2d, scale, bias)       # (N*OH*OW, Co)
    y = y2d.reshape(n, oh, ow, co)

    # MaxPool2d(kernel_size=3, stride=2, padding=1).
    ph, pk, ps = 1, 3, 2
    oh2 = (oh + 2 * ph - pk) // ps + 1
    ow2 = (ow + 2 * ph - pk) // ps + 1
    y_pad = jnp.pad(y, ((0, 0), (ph, ph), (ph, ph), (0, 0)),
                    constant_values=-jnp.inf)
    pool_taps = []
    for dkh in range(pk):
        for dkw in range(pk):
            pool_taps.append(lax.slice(
                y_pad,
                (0, dkh, dkw, 0),
                (n, dkh + ps * (oh2 - 1) + 1,
                 dkw + ps * (ow2 - 1) + 1, co),
                (1, ps, ps, 1)))
    pool_taps = jnp.stack(pool_taps, axis=0).reshape(pk * pk, n * oh2 * ow2, co)

    z2d = _max_over_taps(pool_taps)                        # (N*OH2*OW2, Co)
    z = z2d.reshape(n, oh2, ow2, co)
    return jnp.transpose(z, (0, 3, 1, 2))                  # back to NCHW


if __name__ == "__main__":
    key = jax.random.PRNGKey(0)
    kx, kw_, kg, kb, km, kv = jax.random.split(key, 6)

    # Small shapes consistent with the module (RGB-like 3-channel input).
    n, ci, h, w = 2, 3, 32, 32
    co, ksz = 64, 7
    x = jax.random.normal(kx, (n, ci, h, w), dtype=jnp.float32)
    conv_w = jax.random.normal(kw_, (co, ci, ksz, ksz), dtype=jnp.float32)
    conv_w = conv_w * (2.0 / (ci * ksz * ksz)) ** 0.5      # kaiming-like scale
    gamma = 1.0 + 0.1 * jax.random.normal(kg, (co,), dtype=jnp.float32)
    beta = 0.1 * jax.random.normal(kb, (co,), dtype=jnp.float32)
    run_mean = 0.1 * jax.random.normal(km, (co,), dtype=jnp.float32)
    run_var = 1.0 + 0.1 * jnp.abs(jax.random.normal(kv, (co,), dtype=jnp.float32))

    out = thermal_module_forward(x, conv_w, gamma, beta, run_mean, run_var)
    out = jax.block_until_ready(out)

    # Pure-JAX reference (same math as the PyTorch forward, inference BN).
    eps = 1e-5
    y_ref = lax.conv_general_dilated(
        x, conv_w, window_strides=(2, 2), padding=((3, 3), (3, 3)),
        dimension_numbers=("NCHW", "OIHW", "NCHW"),
        precision=lax.Precision.HIGHEST)
    s_ref = gamma * lax.rsqrt(run_var + eps)
    b_ref = beta - run_mean * s_ref
    y_ref = y_ref * s_ref[None, :, None, None] + b_ref[None, :, None, None]
    y_ref = jnp.maximum(y_ref, 0.0)
    ref = lax.reduce_window(
        y_ref, -jnp.inf, lax.max,
        window_dimensions=(1, 1, 3, 3), window_strides=(1, 1, 2, 2),
        padding=((0, 0), (0, 0), (1, 1), (1, 1)))

    assert out.shape == ref.shape == (n, co, h // 4, w // 4), out.shape
    assert out.dtype == x.dtype
    assert jnp.allclose(out, ref, atol=2e-2, rtol=2e-2), \
        float(jnp.max(jnp.abs(out - ref)))
    print("KERNEL_OK")
</pallas_src>

<mosaic_0001>
module attributes {stable_mosaic.version = 11 : i64} {
  func.func @_conv_bn_relu_kernel(%arg0: i32, %arg1: memref<256x147xf32, #tpu.memory_space<vmem>>, %arg2: memref<147x64xf32, #tpu.memory_space<vmem>>, %arg3: memref<1x64xf32, #tpu.memory_space<vmem>>, %arg4: memref<1x64xf32, #tpu.memory_space<vmem>>, %arg5: memref<256x64xf32, #tpu.memory_space<vmem>>) attributes {dimension_semantics = [#tpu.dimension_semantics<parallel>], iteration_bounds = array<i64: 2>, scalar_prefetch = 0 : i64, scratch_operands = 0 : i64, tpu.core_type = #tpu.core_type<tc>, window_params = [{transform_indices = @transform_0, window_bounds = array<i64: 256, 147>}, {pipeline_mode = #tpu.pipeline_mode<synchronous>, transform_indices = @transform_1, window_bounds = array<i64: 147, 64>}, {pipeline_mode = #tpu.pipeline_mode<synchronous>, transform_indices = @transform_2, window_bounds = array<i64: 1, 64>}, {pipeline_mode = #tpu.pipeline_mode<synchronous>, transform_indices = @transform_3, window_bounds = array<i64: 1, 64>}, {transform_indices = @transform_4, window_bounds = array<i64: 256, 64>}]} {
    %c0 = arith.constant 0 : index
    %c0_0 = arith.constant 0 : index
    %0 = vector.load %arg1[%c0, %c0_0] : memref<256x147xf32, #tpu.memory_space<vmem>>, vector<256x147xf32>
    %c0_1 = arith.constant 0 : index
    %c0_2 = arith.constant 0 : index
    %1 = vector.load %arg2[%c0_1, %c0_2] : memref<147x64xf32, #tpu.memory_space<vmem>>, vector<147x64xf32>
    %cst = arith.constant dense<0.000000e+00> : vector<256x64xf32>
    %2 = tpu.matmul %0, %1, %cst {dimension_numbers = #tpu.dot_dimension_numbers<[1], [0], [0], [1], [0, 0, 1, 1], [], []>} : vector<256x147xf32>, vector<147x64xf32>, vector<256x64xf32> -> vector<256x64xf32>
    %c0_3 = arith.constant 0 : index
    %c0_4 = arith.constant 0 : index
    %3 = vector.load %arg3[%c0_3, %c0_4] : memref<1x64xf32, #tpu.memory_space<vmem>>, vector<1x64xf32>
    %4 = vector.broadcast %3 : vector<1x64xf32> to vector<256x64xf32>
    %5 = arith.mulf %2, %4 : vector<256x64xf32>
    %c0_5 = arith.constant 0 : index
    %c0_6 = arith.constant 0 : index
    %6 = vector.load %arg4[%c0_5, %c0_6] : memref<1x64xf32, #tpu.memory_space<vmem>>, vector<1x64xf32>
    %7 = vector.broadcast %6 : vector<1x64xf32> to vector<256x64xf32>
    %8 = arith.addf %5, %7 : vector<256x64xf32>
    %cst_7 = arith.constant 0.000000e+00 : f32
    %9 = vector.broadcast %cst_7 : f32 to vector<256x64xf32>
    %10 = arith.maximumf %8, %9 : vector<256x64xf32>
    %c0_8 = arith.constant 0 : index
    %c0_9 = arith.constant 0 : index
    %11 = vector.load %arg5[%c0_8, %c0_9] : memref<256x64xf32, #tpu.memory_space<vmem>>, vector<256x64xf32>
    tpu.vector_store %arg5[%c0_8, %c0_9], %10 {strides = array<i32>} : memref<256x64xf32, #tpu.memory_space<vmem>>, vector<256x64xf32>,
    return
  }
  func.func @transform_0(%arg0: i32) -> (i32, i32) {
    %c0_i32 = arith.constant 0 : i32
    %c0_i32_0 = arith.constant 0 : i32
    return %arg0, %c0_i32 : i32, i32
  }
  func.func @transform_1(%arg0: i32) -> (i32, i32) {
    %c0_i32 = arith.constant 0 : i32
    %c0_i32_0 = arith.constant 0 : i32
    %c0_i32_1 = arith.constant 0 : i32
    return %c0_i32, %c0_i32_0 : i32, i32
  }
  func.func @transform_2(%arg0: i32) -> (i32, i32) {
    %c0_i32 = arith.constant 0 : i32
    %c0_i32_0 = arith.constant 0 : i32
    %c0_i32_1 = arith.constant 0 : i32
    return %c0_i32, %c0_i32_0 : i32, i32
  }
  func.func @transform_3(%arg0: i32) -> (i32, i32) {
    %c0_i32 = arith.constant 0 : i32
    %c0_i32_0 = arith.constant 0 : i32
    %c0_i32_1 = arith.constant 0 : i32
    return %c0_i32, %c0_i32_0 : i32, i32
  }
  func.func @transform_4(%arg0: i32) -> (i32, i32) {
    %c0_i32 = arith.constant 0 : i32
    %c0_i32_0 = arith.constant 0 : i32
    return %arg0, %c0_i32 : i32, i32
  }
}

</mosaic_0001>

<bundles_post_ra>
// kernel: tpu_custom_call.1
= control target key start
LH: loop header
LB: loop body
LE: loop exit
PB: predicated region body
PF: predicated region fallthrough
CT: control target
= control target key end

     0   :  { %s952_s15 = smov 0   ;;  %s1286_s0 = inlined_call_operand.vmem [shape: f32[512,147], index: 0, kind: input, shape index: {}]   ;;  %s1287_s1 = inlined_call_operand.vmem [shape: f32[147,64], index: 1, kind: input, shape index: {}]   ;;  %s1288_s2 = inlined_call_operand.vmem [shape: f32[1,64], index: 2, kind: input, shape index: {}]   ;;  %s1289_s3 = inlined_call_operand.vmem [shape: f32[1,64], index: 3, kind: input, shape index: {}]   ;;  %s1290_s4 = inlined_call_operand.vmem [shape: f32[512,64], index: 4, kind: output, shape index: {}]  }
   0x1 LB: > { %s812_s16 = sadd.s32 4294967295, %s923_s15   ;;  %p816_p0 = scmp.ge.s32.totalorder %s923_s15, 1  ;;  %s923_s15 = sphi %s952_s15, %s14_s15  }
   0x2   : > { %p164_p1 = scmp.lt.s32.totalorder %s923_s15, 3 }
   0x4   : > { %p165_p2 = pnand %p816_p0, %p164_p1 }
   0x5   : > { %v268_v0 = vld [vmem:[%s1287_s1] sm:$0xff] (!%p165_p2)  ;;  %v269_v1 = vld [vmem:[%s1287_s1 + $0x8] sm:$0xff] (!%p165_p2)  ;;  %v270_v2 = vld [vmem:[%s1287_s1 + $0x10] sm:$0xff] (!%p165_p2)  ;;  %v925_v3 = vmov (!%p165_p2), 0.0|0.0   ;;  %s817_s25 = sshll.u32 (!%p165_p2), %s812_s16, 5  ;;  %vm287_vm0 = vcmask (!%p165_p2), 154624  }
   0x6   : > { %168 = sbr.rel (%p165_p2) target bundleno = 324 (0x144), region = 36  ;;  %860 = vmatprep.subr.bf16.mxu0 (!%p165_p2), %v925_v3  ;;  %887 = vmatprep.subr.bf16.mxu1 (!%p165_p2), %v925_v3  ;;  %v861_v4 = vpack.c.bf16 (!%p165_p2), %v269_v1, %v268_v0  ;;  %v271_v5 = vld [vmem:[%s1287_s1 + $0x18] sm:$0xff] (!%p165_p2)  ;;  %p192_p3 = scmp.lt.s32.totalorder (!%p165_p2), %s817_s25, 63  ;;  %v272_v7 = vld [vmem:[%s1287_s1 + $0x20] sm:$0xff] (!%p165_p2)  ;;  %v273_v8 = vld [vmem:[%s1287_s1 + $0x28] sm:$0xff] (!%p165_p2)  ;;  %v926_v30 = vmov (!%p165_p2), 0.0  }
   0x7   : > { %v864_v6 = vpack.c.bf16 (!%p165_p2), %v271_v5, %v270_v2  ;;  %v867_v9 = vpack.c.bf16 (!%p165_p2), %v273_v8, %v272_v7  ;;  %v274_v10 = vld [vmem:[%s1287_s1 + $0x30] sm:$0xff] (!%p165_p2)  ;;  %v275_v11 = vld [vmem:[%s1287_s1 + $0x38] sm:$0xff] (!%p165_p2)  ;;  %v276_v15 = vld [vmem:[%s1287_s1 + $0x40] sm:$0xff] (!%p165_p2)  ;;  %vm384_vm1 = vcmask (!%p165_p2), 1042432   ;;  %vm723_vm2 = vcmask (!%p165_p2), 523264  }
   0x8   : > { %862 = vmatpush1.bf16.msra.mxu0 (!%p165_p2), %v861_v4  ;;  %897 = vmatpush1.bf16.msra.mxu1 (!%p165_p2), %v861_v4  ;;  %v870_v14 = vpack.c.bf16 (!%p165_p2), %v275_v11, %v274_v10  ;;  %v277_v16 = vld [vmem:[%s1287_s1 + $0x48] sm:$0xff] (!%p165_p2)  ;;  %v278_v18 = vld [vmem:[%s1287_s1 + $0x50] sm:$0xff] (!%p165_p2)  ;;  %v279_v19 = vld [vmem:[%s1287_s1 + $0x58] sm:$0xff] (!%p165_p2) }
   0x9   : > { %863 = vmatprep.subr.bf16.mxu0 (!%p165_p2), %v925_v3  ;;  %888 = vmatprep.subr.bf16.mxu1 (!%p165_p2), %v925_v3  ;;  %v873_v17 = vpack.c.bf16 (!%p165_p2), %v277_v16, %v276_v15  ;;  %v876_v20 = vpack.c.bf16 (!%p165_p2), %v279_v19, %v278_v18  ;;  %v280_v21 = vld [vmem:[%s1287_s1 + $0x60] sm:$0xff] (!%p165_p2)  ;;  %v281_v22 = vld [vmem:[%s1287_s1 + $0x68] sm:$0xff] (!%p165_p2)  ;;  %v282_v24 = vld [vmem:[%s1287_s1 + $0x70] sm:$0xff] (!%p165_p2) }
   0xa   : > { %v879_v23 = vpack.c.bf16 (!%p165_p2), %v281_v22, %v280_v21  ;;  %v283_v25 = vld [vmem:[%s1287_s1 + $0x78] sm:$0xff] (!%p165_p2)  ;;  %v284_v27 = vld [vmem:[%s1287_s1 + $0x80] sm:$0xff] (!%p165_p2)  ;;  %v285_v28 = vld [vmem:[%s1287_s1 + $0x88] sm:$0xff] (!%p165_p2) }
   0xb   : > { %v882_v26 = vpack.c.bf16 (!%p165_p2), %v283_v25, %v282_v24  ;;  %v885_v29 = vpack.c.bf16 (!%p165_p2), %v285_v28, %v284_v27  ;;  %v286_v31 = vld [vmem:[%s1287_s1 + $0x90] sm:$0x7] (!%p165_p2) }
   0xc   : > { %865 = vmatpush1.bf16.msra.mxu0 (!%p165_p2), %v864_v6  ;;  %898 = vmatpush1.bf16.msra.mxu1 (!%p165_p2), %v864_v6 }
   0xd   : > { %s1292_s25 = smov (!%p192_p3, %s817_s25), 63  ;;  %866 = vmatprep.subr.bf16.mxu0 %v925_v3  ;;  %889 = vmatprep.subr.bf16.mxu1 %v925_v3 }
   0xe   : > { %s859_s30 = sshll.u32 %s1292_s25, 4  ;;  %s821_s16 = sshll.u32 %s1292_s25, 3 }
   0xf   : > { %s991_s9 = scalar_lea.vmem %s1286_s0, %s859_s30  ;;  %s1157_s18 = scalar_lea.vmem %s1290_s4, %s821_s16 }
  0x10   : > { %v205_v12 = vld [vmem:[%s991_s9 + $0x8] sm:$0xff]  ;;  %868 = vmatpush1.bf16.msra.mxu0 %v867_v9  ;;  %899 = vmatpush1.bf16.msra.mxu1 %v867_v9  ;;  %v204_v32 = vld [vmem:[%s991_s9] sm:$0xff]  ;;  %v207_v34 = vld [vmem:[%s991_s9 + $0x18] sm:$0xff] }
  0x11   : > { %v237_v13 = vld [vmem:[%s991_s9 + $0x108] sm:$0xff]  ;;  %823 = vmatprep.mubr.msk.f32.mxu0 %vm287_vm0, %v205_v12  ;;  %869 = vmatprep.subr.bf16.mxu0 %v925_v3  ;;  %v236_v33 = vld [vmem:[%s991_s9 + $0x100] sm:$0xff]  ;;  %v239_v35 = vld [vmem:[%s991_s9 + $0x118] sm:$0xff] }
  0x12   : > { %839 = vmatprep.mubr.msk.f32.mxu1 %vm287_vm0, %v237_v13  ;;  %890 = vmatprep.subr.bf16.mxu1 %v925_v3  ;;  %v206_v36 = vld [vmem:[%s991_s9 + $0x10] sm:$0xff]  ;;  %v209_v38 = vld [vmem:[%s991_s9 + $0x28] sm:$0xff]  ;;  %v208_v40 = vld [vmem:[%s991_s9 + $0x20] sm:$0xff] }
  0x13   : > { %v238_v37 = vld [vmem:[%s991_s9 + $0x110] sm:$0xff]  ;;  %v241_v39 = vld [vmem:[%s991_s9 + $0x128] sm:$0xff]  ;;  %v240_v41 = vld [vmem:[%s991_s9 + $0x120] sm:$0xff] }
  0x14   : > { %871 = vmatpush1.bf16.msra.mxu0 %v870_v14  ;;  %900 = vmatpush1.bf16.msra.mxu1 %v870_v14  ;;  %v211_v42 = vld [vmem:[%s991_s9 + $0x38] sm:$0xff]  ;;  %v210_v44 = vld [vmem:[%s991_s9 + $0x30] sm:$0xff]  ;;  %v213_v46 = vld [vmem:[%s991_s9 + $0x48] sm:$0xff] }
  0x15   : > { %872 = vmatprep.subr.bf16.mxu0 %v925_v3  ;;  %891 = vmatprep.subr.bf16.mxu1 %v925_v3  ;;  %v243_v43 = vld [vmem:[%s991_s9 + $0x138] sm:$0xff]  ;;  %v242_v45 = vld [vmem:[%s991_s9 + $0x130] sm:$0xff]  ;;  %v245_v47 = vld [vmem:[%s991_s9 + $0x148] sm:$0xff] }
  0x16   : > { %v212_v48 = vld [vmem:[%s991_s9 + $0x40] sm:$0xff]  ;;  %v215_v50 = vld [vmem:[%s991_s9 + $0x58] sm:$0xff]  ;;  %v214_v52 = vld [vmem:[%s991_s9 + $0x50] sm:$0xff] }
  0x17   : > { %v244_v49 = vld [vmem:[%s991_s9 + $0x140] sm:$0xff]  ;;  %v247_v51 = vld [vmem:[%s991_s9 + $0x158] sm:$0xff]  ;;  %v246_v53 = vld [vmem:[%s991_s9 + $0x150] sm:$0xff] }
  0x18   : > { %874 = vmatpush1.bf16.msra.mxu0 %v873_v17  ;;  %901 = vmatpush1.bf16.msra.mxu1 %v873_v17  ;;  %v217_v54 = vld [vmem:[%s991_s9 + $0x68] sm:$0xff]  ;;  %v216_v56 = vld [vmem:[%s991_s9 + $0x60] sm:$0xff]  ;;  %v219_v58 = vld [vmem:[%s991_s9 + $0x78] sm:$0xff] }
  0x19   : > { %875 = vmatprep.subr.bf16.mxu0 %v925_v3  ;;  %892 = vmatprep.subr.bf16.mxu1 %v925_v3  ;;  %v249_v55 = vld [vmem:[%s991_s9 + $0x168] sm:$0xff]  ;;  %v248_v57 = vld [vmem:[%s991_s9 + $0x160] sm:$0xff]  ;;  %v251_v59 = vld [vmem:[%s991_s9 + $0x178] sm:$0xff] }
  0x1a   : > { %v218_v60 = vld [vmem:[%s991_s9 + $0x70] sm:$0xff]  ;;  %v221_v62 = vld [vmem:[%s991_s9 + $0x88] sm:$0xff]  ;;  %v220_v0 = vld [vmem:[%s991_s9 + $0x80] sm:$0xff] }
  0x1b   : > { %v250_v61 = vld [vmem:[%s991_s9 + $0x170] sm:$0xff]  ;;  %v253_v63 = vld [vmem:[%s991_s9 + $0x188] sm:$0xff]  ;;  %v252_v1 = vld [vmem:[%s991_s9 + $0x180] sm:$0xff] }
  0x1c   : > { %877 = vmatpush1.bf16.msra.mxu0 %v876_v20  ;;  %902 = vmatpush1.bf16.msra.mxu1 %v876_v20  ;;  %v223_v2 = vld [vmem:[%s991_s9 + $0x98] sm:$0xff]  ;;  %v222_v4 = vld [vmem:[%s991_s9 + $0x90] sm:$0xff]  ;;  %v225_v6 = vld [vmem:[%s991_s9 + $0xa8] sm:$0xff] }
  0x1d   : > { %878 = vmatprep.subr.bf16.mxu0 %v925_v3  ;;  %893 = vmatprep.subr.bf16.mxu1 %v925_v3  ;;  %v254_v5 = vld [vmem:[%s991_s9 + $0x190] sm:$0xff]  ;;  %v257_v7 = vld [vmem:[%s991_s9 + $0x1a8] sm:$0xff]  ;;  %v224_v8 = vld [vmem:[%s991_s9 + $0xa0] sm:$0xff] }
  0x1e   : > { %v256_v9 = vld [vmem:[%s991_s9 + $0x1a0] sm:$0xff]  ;;  %v227_v10 = vld [vmem:[%s991_s9 + $0xb8] sm:$0xff]  ;;  %v226_v12 = vld [vmem:[%s991_s9 + $0xb0] sm:$0xff] }
  0x1f   : > { %v259_v11 = vld [vmem:[%s991_s9 + $0x1b8] sm:$0xff]  ;;  %v258_v13 = vld [vmem:[%s991_s9 + $0x1b0] sm:$0xff]  ;;  %v229_v14 = vld [vmem:[%s991_s9 + $0xc8] sm:$0xff] }
  0x20   : > { %880 = vmatpush1.bf16.msra.mxu0 %v879_v23  ;;  %903 = vmatpush1.bf16.msra.mxu1 %v879_v23  ;;  %v261_v15 = vld [vmem:[%s991_s9 + $0x1c8] sm:$0xff]  ;;  %v228_v16 = vld [vmem:[%s991_s9 + $0xc0] sm:$0xff]  ;;  %v231_v18 = vld [vmem:[%s991_s9 + $0xd8] sm:$0xff] }
  0x21   : > { %881 = vmatprep.subr.bf16.mxu0 %v925_v3  ;;  %894 = vmatprep.subr.bf16.mxu1 %v925_v3  ;;  %v260_v17 = vld [vmem:[%s991_s9 + $0x1c0] sm:$0xff]  ;;  %v263_v19 = vld [vmem:[%s991_s9 + $0x1d8] sm:$0xff]  ;;  %v230_v20 = vld [vmem:[%s991_s9 + $0xd0] sm:$0xff] }
  0x22   : > { %v262_v21 = vld [vmem:[%s991_s9 + $0x1d0] sm:$0xff]  ;;  %v233_v22 = vld [vmem:[%s991_s9 + $0xe8] sm:$0xff]  ;;  %v232_v24 = vld [vmem:[%s991_s9 + $0xe0] sm:$0xff] }
  0x23   : > { %v265_v23 = vld [vmem:[%s991_s9 + $0x1e8] sm:$0xff]  ;;  %v264_v25 = vld [vmem:[%s991_s9 + $0x1e0] sm:$0xff]  ;;  %v267_v27 = vld [vmem:[%s991_s9 + $0x1f8] sm:$0xff] }
  0x24   : > { %883 = vmatpush1.bf16.msra.mxu0 %v882_v26  ;;  %904 = vmatpush1.bf16.msra.mxu1 %v882_v26  ;;  %v235_v26 = vld [vmem:[%s991_s9 + $0xf8] sm:$0xff]  ;;  %v234_v28 = vld [vmem:[%s991_s9 + $0xf0] sm:$0xff] }
  0x25   : > { %884 = vmatprep.subr.bf16.mxu0 %v925_v3  ;;  %895 = vmatprep.subr.bf16.mxu1 %v925_v3  ;;  %v255_v3 = vld [vmem:[%s991_s9 + $0x198] sm:$0xff] }
  0x28   : > { %886 = vmatpush1.bf16.msra.mxu0 %v885_v29  ;;  %905 = vmatpush1.bf16.msra.mxu1 %v885_v29  ;;  %v266_v29 = vld [vmem:[%s991_s9 + $0x1f0] sm:$0xff] }
  0x29   : > { %424 = vmatprep.subr.mxu0 %v926_v30  ;;  %896 = vmatprep.subr.mxu1 %v926_v30  ;;  %v1142_v30 = vld [vmem:[%s1288_s2] ss:$0 sm:$0xff] }
  0x2c   : > { %822 = vmatpush1.msk.msra.mxu0 %vm384_vm1, %v286_v31  ;;  %906 = vmatpush1.msk.msra.mxu1 %vm384_vm1, %v286_v31 }
  0x2d   : > { %453 = vmatmul.mubr.f32.vlgmr.msra.gmra.mrb[0].mxu0 %v204_v32  ;;  %533 = vmatmul.mubr.f32.vlgmr.msra.gmra.mrb[0].mxu1 %v236_v33  ;;  %v1147_v32 = vld [vmem:[%s1289_s3] ss:$0 sm:$0xff] }
  0x2e   : > { %824 = vmatprep.mubr.msk.f32.mxu0 %vm287_vm0, %v207_v34  ;;  %840 = vmatprep.mubr.msk.f32.mxu1 %vm287_vm0, %v239_v35 }
  0x31   : > { %458 = vmatmul.mubr.f32.gmra.mrb[2].mxu0 %v206_v36  ;;  %538 = vmatmul.mubr.f32.gmra.mrb[2].mxu1 %v238_v37 }
  0x32   : > { %825 = vmatprep.mubr.msk.f32.mxu0 %vm287_vm0, %v209_v38  ;;  %841 = vmatprep.mubr.msk.f32.mxu1 %vm287_vm0, %v241_v39 }
  0x35   : > { %463 = vmatmul.mubr.f32.gmra.mrb[4].mxu0 %v208_v40  ;;  %543 = vmatmul.mubr.f32.gmra.mrb[4].mxu1 %v240_v41 }
  0x36   : > { %826 = vmatprep.mubr.msk.f32.mxu0 %vm287_vm0, %v211_v42  ;;  %842 = vmatprep.mubr.msk.f32.mxu1 %vm287_vm0, %v243_v43 }
  0x39   : > { %468 = vmatmul.mubr.f32.gmra.mrb[6].mxu0 %v210_v44  ;;  %548 = vmatmul.mubr.f32.gmra.mrb[6].mxu1 %v242_v45 }
  0x3a   : > { %827 = vmatprep.mubr.msk.f32.mxu0 %vm287_vm0, %v213_v46  ;;  %843 = vmatprep.mubr.msk.f32.mxu1 %vm287_vm0, %v245_v47 }
  0x3d   : > { %473 = vmatmul.mubr.f32.gmra.mrb[8].mxu0 %v212_v48  ;;  %553 = vmatmul.mubr.f32.gmra.mrb[8].mxu1 %v244_v49 }
  0x3e   : > { %828 = vmatprep.mubr.msk.f32.mxu0 %vm287_vm0, %v215_v50  ;;  %844 = vmatprep.mubr.msk.f32.mxu1 %vm287_vm0, %v247_v51 }
  0x41   : > { %478 = vmatmul.mubr.f32.gmra.mrb[10].mxu0 %v214_v52  ;;  %558 = vmatmul.mubr.f32.gmra.mrb[10].mxu1 %v246_v53 }
  0x42   : > { %829 = vmatprep.mubr.msk.f32.mxu0 %vm287_vm0, %v217_v54  ;;  %845 = vmatprep.mubr.msk.f32.mxu1 %vm287_vm0, %v249_v55 }
  0x45   : > { %483 = vmatmul.mubr.f32.gmra.mrb[12].mxu0 %v216_v56  ;;  %563 = vmatmul.mubr.f32.gmra.mrb[12].mxu1 %v248_v57 }
  0x46   : > { %830 = vmatprep.mubr.msk.f32.mxu0 %vm287_vm0, %v219_v58  ;;  %846 = vmatprep.mubr.msk.f32.mxu1 %vm287_vm0, %v251_v59 }
  0x49   : > { %488 = vmatmul.mubr.f32.gmra.mrb[14].mxu0 %v218_v60  ;;  %568 = vmatmul.mubr.f32.gmra.mrb[14].mxu1 %v250_v61 }
  0x4a   : > { %831 = vmatprep.mubr.msk.f32.mxu0 %vm287_vm0, %v221_v62  ;;  %847 = vmatprep.mubr.msk.f32.mxu1 %vm287_vm0, %v253_v63 }
  0x4d   : > { %493 = vmatmul.mubr.f32.gmra.mrb[16].mxu0 %v220_v0  ;;  %573 = vmatmul.mubr.f32.gmra.mrb[16].mxu1 %v252_v1 }
  0x4e   : > { %832 = vmatprep.mubr.msk.f32.mxu0 %vm287_vm0, %v223_v2  ;;  %848 = vmatprep.mubr.msk.f32.mxu1 %vm287_vm0, %v255_v3 }
  0x51   : > { %498 = vmatmul.mubr.f32.gmra.mrb[18].mxu0 %v222_v4  ;;  %578 = vmatmul.mubr.f32.gmra.mrb[18].mxu1 %v254_v5 }
  0x52   : > { %833 = vmatprep.mubr.msk.f32.mxu0 %vm287_vm0, %v225_v6  ;;  %849 = vmatprep.mubr.msk.f32.mxu1 %vm287_vm0, %v257_v7 }
  0x55   : > { %503 = vmatmul.mubr.f32.gmra.mrb[20].mxu0 %v224_v8  ;;  %583 = vmatmul.mubr.f32.gmra.mrb[20].mxu1 %v256_v9 }
  0x56   : > { %834 = vmatprep.mubr.msk.f32.mxu0 %vm287_vm0, %v227_v10  ;;  %850 = vmatprep.mubr.msk.f32.mxu1 %vm287_vm0, %v259_v11 }
  0x59   : > { %508 = vmatmul.mubr.f32.gmra.mrb[22].mxu0 %v226_v12  ;;  %588 = vmatmul.mubr.f32.gmra.mrb[22].mxu1 %v258_v13 }
  0x5a   : > { %835 = vmatprep.mubr.msk.f32.mxu0 %vm287_vm0, %v229_v14  ;;  %851 = vmatprep.mubr.msk.f32.mxu1 %vm287_vm0, %v261_v15 }
  0x5d   : > { %513 = vmatmul.mubr.f32.gmra.mrb[24].mxu0 %v228_v16  ;;  %593 = vmatmul.mubr.f32.gmra.mrb[24].mxu1 %v260_v17 }
  0x5e   : > { %836 = vmatprep.mubr.msk.f32.mxu0 %vm287_vm0, %v231_v18  ;;  %852 = vmatprep.mubr.msk.f32.mxu1 %vm287_vm0, %v263_v19 }
  0x61   : > { %518 = vmatmul.mubr.f32.gmra.mrb[26].mxu0 %v230_v20  ;;  %598 = vmatmul.mubr.f32.gmra.mrb[26].mxu1 %v262_v21 }
  0x62   : > { %837 = vmatprep.mubr.msk.f32.mxu0 %vm287_vm0, %v233_v22  ;;  %853 = vmatprep.mubr.msk.f32.mxu1 %vm287_vm0, %v265_v23 }
  0x65   : > { %523 = vmatmul.mubr.f32.gmra.mrb[28].mxu0 %v232_v24  ;;  %603 = vmatmul.mubr.f32.gmra.mrb[28].mxu1 %v264_v25 }
  0x66   : > { %838 = vmatprep.mubr.msk.f32.mxu0 %vm287_vm0, %v235_v26  ;;  %854 = vmatprep.mubr.msk.f32.mxu1 %vm287_vm0, %v267_v27 }
  0x69   : > { %528 = vmatmul.mubr.f32.gmra.mrb[30].mxu0 %v234_v28  ;;  %608 = vmatmul.mubr.f32.gmra.mrb[30].mxu1 %v266_v29 }
 0x100   : > { %v454_v31 = vpop.f32.mrb[0].mxu0  ;;  %v534_v33 = vpop.f32.mrb[0].mxu1 }
 0x101   : > { %v620_v34 = vmul.f32 %v1142_v30, %v454_v31  ;;  %v636_v35 = vmul.f32 %v1142_v30, %v534_v33  ;;  %v456_v36 = vpop.f32.mrb[1].mxu0  ;;  %v536_v37 = vpop.f32.mrb[1].mxu1 }
 0x103   : > { %v659_v38 = vadd.f32 %v1147_v32, %v620_v34  ;;  %v675_v39 = vadd.f32 %v1147_v32, %v636_v35 }
 0x104   : > { %v459_v40 = vpop.f32.mrb[2].mxu0  ;;  %v539_v41 = vpop.f32.mrb[2].mxu1 }
 0x105   : > { %v691_v42 = vmax.f32 %v659_v38, 0.0  ;;  %v707_v43 = vmax.f32 %v675_v39, 0.0  ;;  %v621_v44 = vmul.f32 %v1142_v30, %v459_v40  ;;  %v637_v45 = vmul.f32 %v1142_v30, %v539_v41  ;;  %v461_v46 = vpop.f32.mrb[3].mxu0  ;;  %v541_v47 = vpop.f32.mrb[3].mxu1 }
 0x107   : > { %724 = vst.msk [vmem:[%s1157_s18] sm:$0xff] %vm723_vm2, %v691_v42  ;;  %740 = vst.msk [vmem:[%s1157_s18 + $0x80] sm:$0xff] %vm723_vm2, %v707_v43  ;;  %v660_v48 = vadd.f32 %v1147_v32, %v621_v44  ;;  %v676_v49 = vadd.f32 %v1147_v32, %v637_v45 }
 0x108   : > { %v464_v50 = vpop.f32.mrb[4].mxu0  ;;  %v544_v51 = vpop.f32.mrb[4].mxu1 }
 0x109   : > { %v692_v52 = vmax.f32 %v660_v48, 0.0  ;;  %v708_v53 = vmax.f32 %v676_v49, 0.0  ;;  %v622_v54 = vmul.f32 %v1142_v30, %v464_v50  ;;  %v638_v55 = vmul.f32 %v1142_v30, %v544_v51  ;;  %v466_v56 = vpop.f32.mrb[5].mxu0  ;;  %v546_v57 = vpop.f32.mrb[5].mxu1 }
 0x10b   : > { %725 = vst.msk [vmem:[%s1157_s18 + $0x8] sm:$0xff] %vm723_vm2, %v692_v52  ;;  %741 = vst.msk [vmem:[%s1157_s18 + $0x88] sm:$0xff] %vm723_vm2, %v708_v53  ;;  %v661_v58 = vadd.f32 %v1147_v32, %v622_v54  ;;  %v677_v59 = vadd.f32 %v1147_v32, %v638_v55 }
 0x10c   : > { %v469_v60 = vpop.f32.mrb[6].mxu0  ;;  %v549_v61 = vpop.f32.mrb[6].mxu1 }
 0x10d   : > { %v693_v62 = vmax.f32 %v661_v58, 0.0  ;;  %v709_v63 = vmax.f32 %v677_v59, 0.0  ;;  %v623_v0 = vmul.f32 %v1142_v30, %v469_v60  ;;  %v639_v1 = vmul.f32 %v1142_v30, %v549_v61  ;;  %v471_v2 = vpop.f32.mrb[7].mxu0  ;;  %v551_v3 = vpop.f32.mrb[7].mxu1 }
 0x10f   : > { %726 = vst.msk [vmem:[%s1157_s18 + $0x10] sm:$0xff] %vm723_vm2, %v693_v62  ;;  %742 = vst.msk [vmem:[%s1157_s18 + $0x90] sm:$0xff] %vm723_vm2, %v709_v63  ;;  %v662_v4 = vadd.f32 %v1147_v32, %v623_v0  ;;  %v678_v5 = vadd.f32 %v1147_v32, %v639_v1 }
 0x110   : > { %v474_v6 = vpop.f32.mrb[8].mxu0  ;;  %v554_v7 = vpop.f32.mrb[8].mxu1 }
 0x111   : > { %v694_v8 = vmax.f32 %v662_v4, 0.0  ;;  %v710_v9 = vmax.f32 %v678_v5, 0.0  ;;  %v624_v10 = vmul.f32 %v1142_v30, %v474_v6  ;;  %v640_v11 = vmul.f32 %v1142_v30, %v554_v7  ;;  %v476_v12 = vpop.f32.mrb[9].mxu0  ;;  %v556_v13 = vpop.f32.mrb[9].mxu1 }
 0x113   : > { %727 = vst.msk [vmem:[%s1157_s18 + $0x18] sm:$0xff] %vm723_vm2, %v694_v8  ;;  %743 = vst.msk [vmem:[%s1157_s18 + $0x98] sm:$0xff] %vm723_vm2, %v710_v9  ;;  %v663_v14 = vadd.f32 %v1147_v32, %v624_v10  ;;  %v679_v15 = vadd.f32 %v1147_v32, %v640_v11 }
 0x114   : > { %v479_v16 = vpop.f32.mrb[10].mxu0  ;;  %v559_v17 = vpop.f32.mrb[10].mxu1 }
 0x115   : > { %v695_v18 = vmax.f32 %v663_v14, 0.0  ;;  %v711_v19 = vmax.f32 %v679_v15, 0.0  ;;  %v625_v20 = vmul.f32 %v1142_v30, %v479_v16  ;;  %v641_v21 = vmul.f32 %v1142_v30, %v559_v17  ;;  %v481_v22 = vpop.f32.mrb[11].mxu0  ;;  %v561_v23 = vpop.f32.mrb[11].mxu1 }
 0x117   : > { %728 = vst.msk [vmem:[%s1157_s18 + $0x20] sm:$0xff] %vm723_vm2, %v695_v18  ;;  %744 = vst.msk [vmem:[%s1157_s18 + $0xa0] sm:$0xff] %vm723_vm2, %v711_v19  ;;  %v664_v24 = vadd.f32 %v1147_v32, %v625_v20  ;;  %v680_v25 = vadd.f32 %v1147_v32, %v641_v21 }
 0x118   : > { %v484_v26 = vpop.f32.mrb[12].mxu0  ;;  %v564_v27 = vpop.f32.mrb[12].mxu1 }
 0x119   : > { %v696_v28 = vmax.f32 %v664_v24, 0.0  ;;  %v712_v29 = vmax.f32 %v680_v25, 0.0  ;;  %v626_v31 = vmul.f32 %v1142_v30, %v484_v26  ;;  %v642_v33 = vmul.f32 %v1142_v30, %v564_v27  ;;  %v486_v34 = vpop.f32.mrb[13].mxu0  ;;  %v566_v35 = vpop.f32.mrb[13].mxu1 }
 0x11b   : > { %729 = vst.msk [vmem:[%s1157_s18 + $0x28] sm:$0xff] %vm723_vm2, %v696_v28  ;;  %745 = vst.msk [vmem:[%s1157_s18 + $0xa8] sm:$0xff] %vm723_vm2, %v712_v29  ;;  %v665_v36 = vadd.f32 %v1147_v32, %v626_v31  ;;  %v681_v37 = vadd.f32 %v1147_v32, %v642_v33 }
 0x11c   : > { %v489_v38 = vpop.f32.mrb[14].mxu0  ;;  %v569_v39 = vpop.f32.mrb[14].mxu1 }
 0x11d   : > { %v697_v40 = vmax.f32 %v665_v36, 0.0  ;;  %v713_v41 = vmax.f32 %v681_v37, 0.0  ;;  %v627_v42 = vmul.f32 %v1142_v30, %v489_v38  ;;  %v643_v43 = vmul.f32 %v1142_v30, %v569_v39  ;;  %v491_v44 = vpop.f32.mrb[15].mxu0  ;;  %v571_v45 = vpop.f32.mrb[15].mxu1 }
 0x11f   : > { %730 = vst.msk [vmem:[%s1157_s18 + $0x30] sm:$0xff] %vm723_vm2, %v697_v40  ;;  %746 = vst.msk [vmem:[%s1157_s18 + $0xb0] sm:$0xff] %vm723_vm2, %v713_v41  ;;  %v666_v46 = vadd.f32 %v1147_v32, %v627_v42  ;;  %v682_v47 = vadd.f32 %v1147_v32, %v643_v43 }
 0x120   : > { %v494_v48 = vpop.f32.mrb[16].mxu0  ;;  %v574_v49 = vpop.f32.mrb[16].mxu1 }
 0x121   : > { %v698_v50 = vmax.f32 %v666_v46, 0.0  ;;  %v714_v51 = vmax.f32 %v682_v47, 0.0  ;;  %v628_v52 = vmul.f32 %v1142_v30, %v494_v48  ;;  %v644_v53 = vmul.f32 %v1142_v30, %v574_v49  ;;  %v496_v54 = vpop.f32.mrb[17].mxu0  ;;  %v576_v55 = vpop.f32.mrb[17].mxu1 }
 0x123   : > { %731 = vst.msk [vmem:[%s1157_s18 + $0x38] sm:$0xff] %vm723_vm2, %v698_v50  ;;  %747 = vst.msk [vmem:[%s1157_s18 + $0xb8] sm:$0xff] %vm723_vm2, %v714_v51  ;;  %v667_v56 = vadd.f32 %v1147_v32, %v628_v52  ;;  %v683_v57 = vadd.f32 %v1147_v32, %v644_v53 }
 0x124   : > { %v499_v58 = vpop.f32.mrb[18].mxu0  ;;  %v579_v59 = vpop.f32.mrb[18].mxu1 }
 0x125   : > { %v699_v60 = vmax.f32 %v667_v56, 0.0  ;;  %v715_v61 = vmax.f32 %v683_v57, 0.0  ;;  %v629_v62 = vmul.f32 %v1142_v30, %v499_v58  ;;  %v645_v63 = vmul.f32 %v1142_v30, %v579_v59  ;;  %v501_v0 = vpop.f32.mrb[19].mxu0  ;;  %v581_v1 = vpop.f32.mrb[19].mxu1 }
 0x127   : > { %732 = vst.msk [vmem:[%s1157_s18 + $0x40] sm:$0xff] %vm723_vm2, %v699_v60  ;;  %748 = vst.msk [vmem:[%s1157_s18 + $0xc0] sm:$0xff] %vm723_vm2, %v715_v61  ;;  %v668_v2 = vadd.f32 %v1147_v32, %v629_v62  ;;  %v684_v3 = vadd.f32 %v1147_v32, %v645_v63 }
 0x128   : > { %v504_v4 = vpop.f32.mrb[20].mxu0  ;;  %v584_v5 = vpop.f32.mrb[20].mxu1 }
 0x129   : > { %v700_v6 = vmax.f32 %v668_v2, 0.0  ;;  %v716_v7 = vmax.f32 %v684_v3, 0.0  ;;  %v630_v8 = vmul.f32 %v1142_v30, %v504_v4  ;;  %v646_v9 = vmul.f32 %v1142_v30, %v584_v5  ;;  %v506_v10 = vpop.f32.mrb[21].mxu0  ;;  %v586_v11 = vpop.f32.mrb[21].mxu1 }
 0x12b   : > { %733 = vst.msk [vmem:[%s1157_s18 + $0x48] sm:$0xff] %vm723_vm2, %v700_v6  ;;  %749 = vst.msk [vmem:[%s1157_s18 + $0xc8] sm:$0xff] %vm723_vm2, %v716_v7  ;;  %v669_v12 = vadd.f32 %v1147_v32, %v630_v8  ;;  %v685_v13 = vadd.f32 %v1147_v32, %v646_v9 }
 0x12c   : > { %v509_v14 = vpop.f32.mrb[22].mxu0  ;;  %v589_v15 = vpop.f32.mrb[22].mxu1 }
 0x12d   : > { %v701_v16 = vmax.f32 %v669_v12, 0.0  ;;  %v717_v17 = vmax.f32 %v685_v13, 0.0  ;;  %v631_v18 = vmul.f32 %v1142_v30, %v509_v14  ;;  %v647_v19 = vmul.f32 %v1142_v30, %v589_v15  ;;  %v511_v20 = vpop.f32.mrb[23].mxu0  ;;  %v591_v21 = vpop.f32.mrb[23].mxu1 }
 0x12f   : > { %734 = vst.msk [vmem:[%s1157_s18 + $0x50] sm:$0xff] %vm723_vm2, %v701_v16  ;;  %750 = vst.msk [vmem:[%s1157_s18 + $0xd0] sm:$0xff] %vm723_vm2, %v717_v17  ;;  %v670_v22 = vadd.f32 %v1147_v32, %v631_v18  ;;  %v686_v23 = vadd.f32 %v1147_v32, %v647_v19 }
 0x130   : > { %v514_v24 = vpop.f32.mrb[24].mxu0  ;;  %v594_v25 = vpop.f32.mrb[24].mxu1 }
 0x131   : > { %v702_v26 = vmax.f32 %v670_v22, 0.0  ;;  %v718_v27 = vmax.f32 %v686_v23, 0.0  ;;  %v632_v28 = vmul.f32 %v1142_v30, %v514_v24  ;;  %v648_v29 = vmul.f32 %v1142_v30, %v594_v25  ;;  %v516_v31 = vpop.f32.mrb[25].mxu0  ;;  %v596_v33 = vpop.f32.mrb[25].mxu1 }
 0x133   : > { %735 = vst.msk [vmem:[%s1157_s18 + $0x58] sm:$0xff] %vm723_vm2, %v702_v26  ;;  %751 = vst.msk [vmem:[%s1157_s18 + $0xd8] sm:$0xff] %vm723_vm2, %v718_v27  ;;  %v671_v34 = vadd.f32 %v1147_v32, %v632_v28  ;;  %v687_v35 = vadd.f32 %v1147_v32, %v648_v29 }
 0x134   : > { %v519_v36 = vpop.f32.mrb[26].mxu0  ;;  %v599_v37 = vpop.f32.mrb[26].mxu1 }
 0x135   : > { %v703_v38 = vmax.f32 %v671_v34, 0.0  ;;  %v719_v39 = vmax.f32 %v687_v35, 0.0  ;;  %v633_v40 = vmul.f32 %v1142_v30, %v519_v36  ;;  %v649_v41 = vmul.f32 %v1142_v30, %v599_v37  ;;  %v521_v42 = vpop.f32.mrb[27].mxu0  ;;  %v601_v43 = vpop.f32.mrb[27].mxu1 }
 0x137   : > { %736 = vst.msk [vmem:[%s1157_s18 + $0x60] sm:$0xff] %vm723_vm2, %v703_v38  ;;  %752 = vst.msk [vmem:[%s1157_s18 + $0xe0] sm:$0xff] %vm723_vm2, %v719_v39  ;;  %v672_v44 = vadd.f32 %v1147_v32, %v633_v40  ;;  %v688_v45 = vadd.f32 %v1147_v32, %v649_v41 }
 0x138   : > { %v524_v46 = vpop.f32.mrb[28].mxu0  ;;  %v604_v47 = vpop.f32.mrb[28].mxu1 }
 0x139   : > { %v704_v48 = vmax.f32 %v672_v44, 0.0  ;;  %v720_v49 = vmax.f32 %v688_v45, 0.0  ;;  %v634_v50 = vmul.f32 %v1142_v30, %v524_v46  ;;  %v650_v51 = vmul.f32 %v1142_v30, %v604_v47  ;;  %v526_v52 = vpop.f32.mrb[29].mxu0  ;;  %v606_v53 = vpop.f32.mrb[29].mxu1 }
 0x13b   : > { %737 = vst.msk [vmem:[%s1157_s18 + $0x68] sm:$0xff] %vm723_vm2, %v704_v48  ;;  %753 = vst.msk [vmem:[%s1157_s18 + $0xe8] sm:$0xff] %vm723_vm2, %v720_v49  ;;  %v673_v54 = vadd.f32 %v1147_v32, %v634_v50  ;;  %v689_v55 = vadd.f32 %v1147_v32, %v650_v51 }
 0x13c   : > { %v529_v56 = vpop.f32.mrb[30].mxu0  ;;  %v609_v57 = vpop.f32.mrb[30].mxu1 }
 0x13d   : > { %v705_v58 = vmax.f32 %v673_v54, 0.0  ;;  %v721_v59 = vmax.f32 %v689_v55, 0.0  ;;  %v635_v60 = vmul.f32 %v1142_v30, %v529_v56  ;;  %v651_v61 = vmul.f32 %v1142_v30, %v609_v57  ;;  %v531_v62 = vpop.f32.mrb[31].mxu0  ;;  %v611_v63 = vpop.f32.mrb[31].mxu1 }
 0x13f   : > { %738 = vst.msk [vmem:[%s1157_s18 + $0x70] sm:$0xff] %vm723_vm2, %v705_v58  ;;  %754 = vst.msk [vmem:[%s1157_s18 + $0xf0] sm:$0xff] %vm723_vm2, %v721_v59  ;;  %v674_v0 = vadd.f32 %v1147_v32, %v635_v60  ;;  %v690_v1 = vadd.f32 %v1147_v32, %v651_v61 }
 0x141   : > { %v706_v2 = vmax.f32 %v674_v0, 0.0  ;;  %v722_v3 = vmax.f32 %v690_v1, 0.0 }
 0x143   : > { %739 = vst.msk [vmem:[%s1157_s18 + $0x78] sm:$0xff] %vm723_vm2, %v706_v2  ;;  %755 = vst.msk [vmem:[%s1157_s18 + $0xf8] sm:$0xff] %vm723_vm2, %v722_v3 }
 0x144 PF: > { %s14_s15 = sadd.s32 1, %s923_s15  }
 0x145   : > { %p11_p4 = scmp.ge.s32.totalorder %s14_s15, 4  }
 0x147   :  { %13 = sbr.rel (!%p11_p4) target bundleno = 1 (0x1), region = 66 }

</bundles_post_ra>
